<compile_context>
chip_gen: v7x
topology: tpu7x:2x2x1
jax: 0.10.0
libtpu: 0.0.40
codegen_flags: <defaults>
</compile_context>

<pallas_src>
import functools

import jax
import jax.numpy as jnp
from jax.experimental import pallas as pl
from jax.experimental.pallas import tpu as pltpu

LANE = 128        # lane width: hidden/action dims padded to multiples of this
DEFAULT_TB = 512  # target batch tile for training-size batches


def _round_up(n, m):
    return ((n + m - 1) // m) * m


def _sublane(dtype):
    # sublane packing factor for the second-minor axis
    return {4: 8, 2: 16, 1: 32}[jnp.dtype(dtype).itemsize]


def _dqn_kernel(x_ref, w1_ref, b1_ref, w2_ref, b2_ref, w3_ref, b3_ref, out_ref):
    # fc1 + ReLU   (compute-dtype operands -> f32 accumulation on the MXU)
    h1 = jnp.dot(x_ref[...], w1_ref[...], preferred_element_type=jnp.float32)
    h1 = jnp.maximum(h1 + b1_ref[...], 0.0).astype(w2_ref.dtype)
    # fc2 + ReLU
    h2 = jnp.dot(h1, w2_ref[...], preferred_element_type=jnp.float32)
    h2 = jnp.maximum(h2 + b2_ref[...], 0.0).astype(w3_ref.dtype)
    # fc3 (Q-values), already f32
    q = jnp.dot(h2, w3_ref[...], preferred_element_type=jnp.float32)
    out_ref[...] = q + b3_ref[...]


def prepare_params(params, compute_dtype=jnp.bfloat16):
    """Pad + cast weights/biases once (reuse across every forward call).

    w1 keeps its real input width (d_in); fc1/fc2/n_actions are padded to 128
    lanes.  Weights are cast to the MXU compute dtype, biases stay f32.
    """
    def pad2(a, rows, cols, dtype):
        out = jnp.zeros((rows, cols), dtype)
        return out.at[: a.shape[0], : a.shape[1]].set(a.astype(dtype))

    w1, b1 = params["w1"], params["b1"]
    w2, b2 = params["w2"], params["b2"]
    w3, b3 = params["w3"], params["b3"]

    d_in, fc1 = w1.shape
    fc2 = w2.shape[1]
    n_actions = w3.shape[1]
    fc1_p = _round_up(fc1, LANE)
    fc2_p = _round_up(fc2, LANE)
    na_p = _round_up(n_actions, LANE)

    return {
        "w1": pad2(w1, d_in, fc1_p, compute_dtype),
        "b1": pad2(b1, 1, fc1_p, jnp.float32),
        "w2": pad2(w2, fc1_p, fc2_p, compute_dtype),
        "b2": pad2(b2, 1, fc2_p, jnp.float32),
        "w3": pad2(w3, fc2_p, na_p, compute_dtype),
        "b3": pad2(b3, 1, na_p, jnp.float32),
    }


@functools.partial(jax.jit, static_argnames=("n_actions",))
def dqn_forward(state, prepared, n_actions):
    """Jitted forward: batch-pad -> batch-tiled pallas_call -> slice.

    state:    (B, d_in) float32
    prepared: output of prepare_params (padded/cast weights + biases)
    returns:  (B, n_actions) float32
    """
    w1p, b1p = prepared["w1"], prepared["b1"]
    w2p, b2p = prepared["w2"], prepared["b2"]
    w3p, b3p = prepared["w3"], prepared["b3"]
    compute_dtype = w1p.dtype
    sub = _sublane(compute_dtype)

    B, d_in = state.shape
    assert d_in == w1p.shape[0], "state feature dim must match w1"
    fc1_p, fc2_p, na_p = w1p.shape[1], w2p.shape[1], w3p.shape[1]

    # ---- ragged batch tiling ---------------------------------------------
    # Enough ~DEFAULT_TB tiles to cover B; once the batch is training-sized,
    # force an even tile count so v7x can shard the parallel axis over its
    # 2 TensorCores (no effect on v5e/v6e beyond one tiny extra grid step).
    n_tiles = max(1, pl.cdiv(B, DEFAULT_TB))
    if B >= 256 and n_tiles % 2 == 1:
        n_tiles += 1
    tb = _round_up(pl.cdiv(B, n_tiles), sub)
    b_p = tb * n_tiles

    # Batch-pad + cast the activation only (weights already prepared).
    # Feature axis stays at d_in (== full array dim -> legal BlockSpec).
    xp = jnp.zeros((b_p, d_in), compute_dtype).at[:B].set(state.astype(compute_dtype))

    # Weights/biases: full-array blocks with constant index_map -> VMEM
    # resident across all batch tiles.
    resident = lambda a: pl.BlockSpec(a.shape, lambda i: (0, 0))

    itemsize = jnp.dtype(compute_dtype).itemsize
    cost = pl.CostEstimate(
        flops=2 * b_p * (d_in * fc1_p + fc1_p * fc2_p + fc2_p * na_p),
        transcendentals=0,
        bytes_accessed=(xp.size + w1p.size + w2p.size + w3p.size) * itemsize
        + (b1p.size + b2p.size + b3p.size) * 4
        + b_p * na_p * 4,
    )

    out_padded = pl.pallas_call(
        _dqn_kernel,
        out_shape=jax.ShapeDtypeStruct((b_p, na_p), jnp.float32),
        grid=(n_tiles,),
        in_specs=[
            pl.BlockSpec((tb, d_in), lambda i: (i, 0)),
            resident(w1p), resident(b1p),
            resident(w2p), resident(b2p),
            resident(w3p), resident(b3p),
        ],
        out_specs=pl.BlockSpec((tb, na_p), lambda i: (i, 0)),
        compiler_params=pltpu.CompilerParams(
            dimension_semantics=("parallel",),
        ),
        cost_estimate=cost,
    )(xp, w1p, b1p, w2p, b2p, w3p, b3p)

    return out_padded[:B, :n_actions]


def init_params(key, input_dims, fc1_dims, fc2_dims, n_actions):
    """Deterministic init mimicking nn.Linear default U(-1/sqrt(fan_in), 1/sqrt(fan_in))."""
    def linear(key, fan_in, fan_out):
        kw, kb = jax.random.split(key)
        bound = 1.0 / jnp.sqrt(jnp.float32(fan_in))
        w = jax.random.uniform(kw, (fan_in, fan_out), jnp.float32, -bound, bound)
        b = jax.random.uniform(kb, (1, fan_out), jnp.float32, -bound, bound)
        return w, b

    k1, k2, k3 = jax.random.split(key, 3)
    w1, b1 = linear(k1, input_dims, fc1_dims)
    w2, b2 = linear(k2, fc1_dims, fc2_dims)
    w3, b3 = linear(k3, fc2_dims, n_actions)
    return {"w1": w1, "b1": b1, "w2": w2, "b2": b2, "w3": w3, "b3": b3}


def reference_forward(state, p):
    h1 = jnp.maximum(state @ p["w1"] + p["b1"], 0.0)
    h2 = jnp.maximum(h1 @ p["w2"] + p["b2"], 0.0)
    return h2 @ p["w3"] + p["b3"]


if __name__ == "__main__":
    # TODO(synk): Adam optimizer / MSELoss / device plumbing from the PyTorch
    # module are training-side and not part of the forward kernel.
    input_dims, fc1_dims, fc2_dims, n_actions = 8, 32, 32, 4

    key = jax.random.PRNGKey(0)
    kx, kp, kx2 = jax.random.split(key, 3)
    params = init_params(kp, input_dims, fc1_dims, fc2_dims, n_actions)

    # Pad + cast weights exactly once; reused by every forward call below.
    prepared = prepare_params(params, compute_dtype=jnp.bfloat16)

    # Small batch (typical DQN action selection) -> single-tile path through
    # the same jitted wrapper.
    batch = 2
    state = jax.random.normal(kx, (batch, input_dims), jnp.float32)
    out = jax.block_until_ready(dqn_forward(state, prepared, n_actions=n_actions))
    ref = reference_forward(state, params)
    assert out.shape == (batch, n_actions)
    # bf16 MXU operands + f32 accumulation -> compare with bf16-level tolerance.
    assert jnp.allclose(out, ref, atol=5e-2, rtol=5e-2), "mismatch vs reference (small batch)"

    # Larger batch exercising the ragged multi-tile path (300 -> 2 tiles of 160).
    batch2 = 300
    state2 = jax.random.normal(kx2, (batch2, input_dims), jnp.float32)
    out2 = jax.block_until_ready(dqn_forward(state2, prepared, n_actions=n_actions))
    ref2 = reference_forward(state2, params)
    assert out2.shape == (batch2, n_actions)
    assert jnp.allclose(out2, ref2, atol=5e-2, rtol=5e-2), "mismatch vs reference (tiled batch)"

    print("KERNEL_OK")
</pallas_src>

<mosaic_0001>
module attributes {stable_mosaic.version = 11 : i64} {
  func.func @_dqn_kernel(%arg0: i32, %arg1: memref<16x8xbf16, #tpu.memory_space<vmem>>, %arg2: memref<8x128xbf16, #tpu.memory_space<vmem>>, %arg3: memref<1x128xf32, #tpu.memory_space<vmem>>, %arg4: memref<128x128xbf16, #tpu.memory_space<vmem>>, %arg5: memref<1x128xf32, #tpu.memory_space<vmem>>, %arg6: memref<128x128xbf16, #tpu.memory_space<vmem>>, %arg7: memref<1x128xf32, #tpu.memory_space<vmem>>, %arg8: memref<16x128xf32, #tpu.memory_space<vmem>>) attributes {dimension_semantics = [#tpu.dimension_semantics<parallel>], iteration_bounds = array<i64: 1>, scalar_prefetch = 0 : i64, scratch_operands = 0 : i64, tpu.core_type = #tpu.core_type<tc>, window_params = [{transform_indices = @transform_0, window_bounds = array<i64: 16, 8>}, {pipeline_mode = #tpu.pipeline_mode<synchronous>, transform_indices = @transform_1, window_bounds = array<i64: 8, 128>}, {pipeline_mode = #tpu.pipeline_mode<synchronous>, transform_indices = @transform_2, window_bounds = array<i64: 1, 128>}, {pipeline_mode = #tpu.pipeline_mode<synchronous>, transform_indices = @transform_3, window_bounds = array<i64: 128, 128>}, {pipeline_mode = #tpu.pipeline_mode<synchronous>, transform_indices = @transform_4, window_bounds = array<i64: 1, 128>}, {pipeline_mode = #tpu.pipeline_mode<synchronous>, transform_indices = @transform_5, window_bounds = array<i64: 128, 128>}, {pipeline_mode = #tpu.pipeline_mode<synchronous>, transform_indices = @transform_6, window_bounds = array<i64: 1, 128>}, {transform_indices = @transform_7, window_bounds = array<i64: 16, 128>}]} {
    %c0 = arith.constant 0 : index
    %c0_0 = arith.constant 0 : index
    %0 = vector.load %arg1[%c0, %c0_0] : memref<16x8xbf16, #tpu.memory_space<vmem>>, vector<16x8xbf16>
    %c0_1 = arith.constant 0 : index
    %c0_2 = arith.constant 0 : index
    %1 = vector.load %arg2[%c0_1, %c0_2] : memref<8x128xbf16, #tpu.memory_space<vmem>>, vector<8x128xbf16>
    %cst = arith.constant dense<0.000000e+00> : vector<16x128xf32>
    %2 = tpu.matmul %0, %1, %cst {dimension_numbers = #tpu.dot_dimension_numbers<[1], [0], [0], [1], [0, 0, 1, 1], [], []>} : vector<16x8xbf16>, vector<8x128xbf16>, vector<16x128xf32> -> vector<16x128xf32>
    %c0_3 = arith.constant 0 : index
    %c0_4 = arith.constant 0 : index
    %3 = vector.load %arg3[%c0_3, %c0_4] : memref<1x128xf32, #tpu.memory_space<vmem>>, vector<1x128xf32>
    %4 = vector.broadcast %3 : vector<1x128xf32> to vector<16x128xf32>
    %5 = arith.addf %2, %4 : vector<16x128xf32>
    %cst_5 = arith.constant 0.000000e+00 : f32
    %6 = vector.broadcast %cst_5 : f32 to vector<16x128xf32>
    %7 = arith.maximumf %5, %6 : vector<16x128xf32>
    %8 = arith.truncf %7 : vector<16x128xf32> to vector<16x128xbf16>
    %c0_6 = arith.constant 0 : index
    %c0_7 = arith.constant 0 : index
    %9 = vector.load %arg4[%c0_6, %c0_7] : memref<128x128xbf16, #tpu.memory_space<vmem>>, vector<128x128xbf16>
    %cst_8 = arith.constant dense<0.000000e+00> : vector<16x128xf32>
    %10 = tpu.matmul %8, %9, %cst_8 {dimension_numbers = #tpu.dot_dimension_numbers<[1], [0], [0], [1], [0, 0, 1, 1], [], []>} : vector<16x128xbf16>, vector<128x128xbf16>, vector<16x128xf32> -> vector<16x128xf32>
    %c0_9 = arith.constant 0 : index
    %c0_10 = arith.constant 0 : index
    %11 = vector.load %arg5[%c0_9, %c0_10] : memref<1x128xf32, #tpu.memory_space<vmem>>, vector<1x128xf32>
    %12 = vector.broadcast %11 : vector<1x128xf32> to vector<16x128xf32>
    %13 = arith.addf %10, %12 : vector<16x128xf32>
    %cst_11 = arith.constant 0.000000e+00 : f32
    %14 = vector.broadcast %cst_11 : f32 to vector<16x128xf32>
    %15 = arith.maximumf %13, %14 : vector<16x128xf32>
    %16 = arith.truncf %15 : vector<16x128xf32> to vector<16x128xbf16>
    %c0_12 = arith.constant 0 : index
    %c0_13 = arith.constant 0 : index
    %17 = vector.load %arg6[%c0_12, %c0_13] : memref<128x128xbf16, #tpu.memory_space<vmem>>, vector<128x128xbf16>
    %cst_14 = arith.constant dense<0.000000e+00> : vector<16x128xf32>
    %18 = tpu.matmul %16, %17, %cst_14 {dimension_numbers = #tpu.dot_dimension_numbers<[1], [0], [0], [1], [0, 0, 1, 1], [], []>} : vector<16x128xbf16>, vector<128x128xbf16>, vector<16x128xf32> -> vector<16x128xf32>
    %c0_15 = arith.constant 0 : index
    %c0_16 = arith.constant 0 : index
    %19 = vector.load %arg7[%c0_15, %c0_16] : memref<1x128xf32, #tpu.memory_space<vmem>>, vector<1x128xf32>
    %20 = vector.broadcast %19 : vector<1x128xf32> to vector<16x128xf32>
    %21 = arith.addf %18, %20 : vector<16x128xf32>
    %c0_17 = arith.constant 0 : index
    %c0_18 = arith.constant 0 : index
    %22 = vector.load %arg8[%c0_17, %c0_18] : memref<16x128xf32, #tpu.memory_space<vmem>>, vector<16x128xf32>
    tpu.vector_store %arg8[%c0_17, %c0_18], %21 {strides = array<i32>} : memref<16x128xf32, #tpu.memory_space<vmem>>, vector<16x128xf32>,
    return
  }
  func.func @transform_0(%arg0: i32) -> (i32, i32) {
    %c0_i32 = arith.constant 0 : i32
    %c0_i32_0 = arith.constant 0 : i32
    return %arg0, %c0_i32 : i32, i32
  }
  func.func @transform_1(%arg0: i32) -> (i32, i32) {
    %c0_i32 = arith.constant 0 : i32
    %c0_i32_0 = arith.constant 0 : i32
    %c0_i32_1 = arith.constant 0 : i32
    return %c0_i32, %c0_i32_0 : i32, i32
  }
  func.func @transform_2(%arg0: i32) -> (i32, i32) {
    %c0_i32 = arith.constant 0 : i32
    %c0_i32_0 = arith.constant 0 : i32
    %c0_i32_1 = arith.constant 0 : i32
    return %c0_i32, %c0_i32_0 : i32, i32
  }
  func.func @transform_3(%arg0: i32) -> (i32, i32) {
    %c0_i32 = arith.constant 0 : i32
    %c0_i32_0 = arith.constant 0 : i32
    %c0_i32_1 = arith.constant 0 : i32
    return %c0_i32, %c0_i32_0 : i32, i32
  }
  func.func @transform_4(%arg0: i32) -> (i32, i32) {
    %c0_i32 = arith.constant 0 : i32
    %c0_i32_0 = arith.constant 0 : i32
    %c0_i32_1 = arith.constant 0 : i32
    return %c0_i32, %c0_i32_0 : i32, i32
  }
  func.func @transform_5(%arg0: i32) -> (i32, i32) {
    %c0_i32 = arith.constant 0 : i32
    %c0_i32_0 = arith.constant 0 : i32
    %c0_i32_1 = arith.constant 0 : i32
    return %c0_i32, %c0_i32_0 : i32, i32
  }
  func.func @transform_6(%arg0: i32) -> (i32, i32) {
    %c0_i32 = arith.constant 0 : i32
    %c0_i32_0 = arith.constant 0 : i32
    %c0_i32_1 = arith.constant 0 : i32
    return %c0_i32, %c0_i32_0 : i32, i32
  }
  func.func @transform_7(%arg0: i32) -> (i32, i32) {
    %c0_i32 = arith.constant 0 : i32
    %c0_i32_0 = arith.constant 0 : i32
    return %arg0, %c0_i32 : i32, i32
  }
}

</mosaic_0001>

<bundles_post_ra>
// kernel: dqn_forward.1
= control target key start
LH: loop header
LB: loop body
LE: loop exit
PB: predicated region body
PF: predicated region fallthrough
CT: control target
= control target key end

     0   :  { %12 = vsyncpa [#allocation3], 0  ;;  %s629_s0 = inlined_call_operand.vmem [shape: bf16[16,8], index: 0, kind: input, shape index: {}]   ;;  %s630_s1 = inlined_call_operand.vmem [shape: bf16[8,128], index: 1, kind: input, shape index: {}]   ;;  %s631_s2 = inlined_call_operand.vmem [shape: f32[1,128], index: 2, kind: input, shape index: {}]   ;;  %s632_s3 = inlined_call_operand.hbm [shape: bf16[128,128], index: 3, kind: input, shape index: {}]   ;;  %s633_s4 = inlined_call_operand.vmem [shape: f32[1,128], index: 4, kind: input, shape index: {}]   ;;  %s634_s5 = inlined_call_operand.hbm [shape: bf16[128,128], index: 5, kind: input, shape index: {}]   ;;  %s635_s6 = inlined_call_operand.vmem [shape: f32[1,128], index: 6, kind: input, shape index: {}]   ;;  %s636_s7 = inlined_call_operand.vmem [shape: f32[16,128], index: 7, kind: output, shape index: {}]  }
   0x1   :  { %13 = vsyncpa [#allocation5], 0  ;;  %s515_s24 = smov [#allocation2]   ;;  %s467_s28 = scalar_lea.hbm %s632_s3, 1024 }
   0x2   :  { %s25_s25 = sshll.u32 %s515_s24, 4  ;;  %p468_p0 = scmp.ne.s32.totalorder %s632_s3, %s467_s28  ;;  %s26_s25 = int_to_ptr.vmem [resolvable:$true] %s25_s25 }
   0x3   :  { %p471_p1 = scmp.lt.u32.totalorder %s467_s28, %s632_s3 }
   0x5   :  { %p473_p2 = pnand %p471_p1, %p468_p0 }
   0x7   :  { %476 = shalt.err (!%p473_p2)
}
   0x8   :  { %s477_s10 = scalar_lea.vmem %s26_s25, 1024  ;;  %p482_p4 = scmp.lt.s32.totalorder %s26_s25, %s26_s25 }
   0x9   :  { %p478_p3 = scmp.ne.s32.totalorder %s26_s25, %s477_s10  ;;  %p483_p5 = scmp.lt.s32.totalorder %s477_s10, %s477_s10 }
   0xb   :  { %p484_p6 = por %p483_p5, %p482_p4 }
   0xd   :  { %p485_p7 = pnand %p484_p6, %p478_p3 }
   0xf   :  { %488 = shalt.err (!%p485_p7)
}
  0x10   :  { %s516_s11 = smov 64   ;;  %s517_s12 = smov 4  }
  0x11   :  { %31 = dma.hbm_to_vmem [thread:$0]  %s632_s3, 1024, %s26_s25, [#allocation3], %s516_s11, %s516_s11, %s517_s12  }
  0x12   :  { %s518_s15 = smov [#allocation4]   ;;  %s489_s19 = scalar_lea.hbm %s634_s5, 1024 }
  0x13   :  { %s39_s16 = sshll.u32 %s518_s15, 4  ;;  %p490_p8 = scmp.ne.s32.totalorder %s634_s5, %s489_s19  ;;  %s40_s16 = int_to_ptr.vmem [resolvable:$true] %s39_s16 }
  0x14   :  { %p493_p9 = scmp.lt.u32.totalorder %s489_s19, %s634_s5 }
  0x16   :  { %p495_p10 = pnand %p493_p9, %p490_p8 }
  0x18   :  { %498 = shalt.err (!%p495_p10)
}
  0x19   :  { %s499_s24 = scalar_lea.vmem %s40_s16, 1024  ;;  %p504_p12 = scmp.lt.s32.totalorder %s40_s16, %s40_s16 }
  0x1a   :  { %p500_p11 = scmp.ne.s32.totalorder %s40_s16, %s499_s24  ;;  %p505_p13 = scmp.lt.s32.totalorder %s499_s24, %s499_s24 }
  0x1c   :  { %p506_p0 = por %p505_p13, %p504_p12 }
  0x1e   :  { %p507_p1 = pnand %p506_p0, %p500_p11 }
  0x20   :  { %510 = shalt.err (!%p507_p1)
}
  0x21   :  { %45 = dma.hbm_to_vmem [thread:$0]  %s634_s5, 1024, %s40_s16, [#allocation5], %s516_s11, %s516_s11, %s517_s12  }
  0x22   :  { %511 = dma.done.wait [#allocation3], 1024  }
  0x23   :  { %512 = vsyncadd [#allocation3], 4294966272 }
  0x24   :  { %513 = dma.done.wait [#allocation5], 1024  }
  0x25   :  { %514 = vsyncadd [#allocation5], 4294966272  ;;  %v519_v0 = vmov 0.0   ;;  %vm520_vm0 = vmmov 0   ;;  %vm74_vm1 = vcmask 1043456   ;;  %v450_v3 = vld [vmem:[%s629_s0] sm:$0xff]  }
  0x26   :  { %398 = vmatprep.subr.bf16.mxu0 %v519_v0  ;;  %400 = vmatprep.mubr.msk.bf16.mxu0 %vm520_vm0, %v519_v0  ;;  %v57_v1 = vld [vmem:[%s630_s1] sm:$0xf]  ;;  %vm70_vm2 = vcmask 64512   ;;  %v452_v5 = vld [vmem:[#allocation2 + $0x8] sm:$0xff]   ;;  %v453_v6 = vld [vmem:[#allocation2 + $0x10] sm:$0xff]  }
  0x27   :  { %404 = vmatprep.subr.bf16.mxu1 %v519_v0  ;;  %420 = vmatprep.mubr.msk.bf16.mxu1 %vm520_vm0, %v519_v0  ;;  %v76_v2 = vsel %vm74_vm1, %v57_v1, 0  ;;  %v451_v4 = vld [vmem:[#allocation2] sm:$0xff]   ;;  %v454_v7 = vld [vmem:[#allocation2 + $0x18] sm:$0xff]   ;;  %v456_v9 = vld [vmem:[#allocation2 + $0x28] sm:$0xff]  }
  0x28   :  { %399 = vmatpush3.bf16.msra.mxu0 %v76_v2  ;;  %405 = vmatpush3.bf16.msra.mxu1 %v451_v4  ;;  %v455_v8 = vld [vmem:[#allocation2 + $0x20] sm:$0xff]   ;;  %v457_v10 = vld [vmem:[#allocation2 + $0x30] sm:$0xff]   ;;  %v458_v11 = vld [vmem:[#allocation2 + $0x38] sm:$0xff]  }
  0x29   :  { %424 = vmatprep.subr.bf16.mxu0 %v519_v0  ;;  %406 = vmatprep.subr.bf16.mxu1 %v519_v0  ;;  %v459_v12 = vld [vmem:[#allocation4] sm:$0xff]   ;;  %v460_v13 = vld [vmem:[#allocation4 + $0x8] sm:$0xff]   ;;  %v461_v14 = vld [vmem:[#allocation4 + $0x10] sm:$0xff]  }
  0x2a   :  { %v462_v15 = vld [vmem:[#allocation4 + $0x18] sm:$0xff]   ;;  %v463_v16 = vld [vmem:[#allocation4 + $0x20] sm:$0xff]   ;;  %v464_v17 = vld [vmem:[#allocation4 + $0x28] sm:$0xff]  }
  0x2b   :  { %401 = vmatmul.mubr.msk.bf16.vlgmr.msra.gmra.mrb[0].mxu0 %vm70_vm2, %v450_v3  ;;  %v357_v18 = vld [vmem:[%s631_s2] ss:$0 sm:$0xff]  ;;  %v465_v28 = vld [vmem:[#allocation4 + $0x30] sm:$0xff]   ;;  %v466_v29 = vld [vmem:[#allocation4 + $0x38] sm:$0xff]  }
  0x2c   :  { %440 = vmatprep.mubr.msk.bf16.mxu0 %vm520_vm0, %v519_v0  ;;  %407 = vmatpush3.bf16.msra.mxu1 %v452_v5  ;;  %v360_v30 = vld [vmem:[%s633_s4] ss:$0 sm:$0xff] }
  0x2d   :  { %408 = vmatprep.subr.bf16.mxu1 %v519_v0  ;;  %425 = vmatpush3.bf16.msra.mxu0 %v459_v12  ;;  %v369_v40 = vld [vmem:[%s635_s6] ss:$0 sm:$0xff] }
  0x2e   :  { %426 = vmatprep.subr.bf16.mxu0 %v519_v0 }
  0x30   :  { %409 = vmatpush3.bf16.msra.mxu1 %v453_v6 }
  0x31   :  { %410 = vmatprep.subr.bf16.mxu1 %v519_v0  ;;  %427 = vmatpush3.bf16.msra.mxu0 %v460_v13 }
  0x32   :  { %428 = vmatprep.subr.bf16.mxu0 %v519_v0 }
  0x34   :  { %411 = vmatpush3.bf16.msra.mxu1 %v454_v7 }
  0x35   :  { %412 = vmatprep.subr.bf16.mxu1 %v519_v0  ;;  %429 = vmatpush3.bf16.msra.mxu0 %v461_v14 }
  0x36   :  { %430 = vmatprep.subr.bf16.mxu0 %v519_v0 }
  0x38   :  { %413 = vmatpush3.bf16.msra.mxu1 %v455_v8 }
  0x39   :  { %414 = vmatprep.subr.bf16.mxu1 %v519_v0  ;;  %431 = vmatpush3.bf16.msra.mxu0 %v462_v15 }
  0x3a   :  { %432 = vmatprep.subr.bf16.mxu0 %v519_v0 }
  0x3c   :  { %415 = vmatpush3.bf16.msra.mxu1 %v456_v9 }
  0x3d   :  { %416 = vmatprep.subr.bf16.mxu1 %v519_v0  ;;  %433 = vmatpush3.bf16.msra.mxu0 %v463_v16 }
  0x3e   :  { %434 = vmatprep.subr.bf16.mxu0 %v519_v0 }
  0x40   :  { %417 = vmatpush3.bf16.msra.mxu1 %v457_v10 }
  0x41   :  { %418 = vmatprep.subr.bf16.mxu1 %v519_v0  ;;  %435 = vmatpush3.bf16.msra.mxu0 %v464_v17 }
  0x42   :  { %436 = vmatprep.subr.bf16.mxu0 %v519_v0 }
  0x44   :  { %419 = vmatpush3.bf16.msra.mxu1 %v458_v11 }
  0x45   :  { %437 = vmatpush3.bf16.msra.mxu0 %v465_v28 }
  0x46   :  { %438 = vmatprep.subr.bf16.mxu0 %v519_v0 }
  0x49   :  { %439 = vmatpush3.bf16.msra.mxu0 %v466_v29 }
  0xfe   :  { %v112_v19 = vpop.f32.mrb[0].mxu0 }
  0xff   :  { %v113_v20 = vadd.f32 %v357_v18, %v112_v19  ;;  %v402_v21 = vpop.f32.mrb[1].mxu0 }
 0x100   :  { %v115_v22 = vpop.f32.mrb[2].mxu0 }
 0x101   :  { %v116_v23 = vadd.f32 %v357_v18, %v115_v22  ;;  %v403_v24 = vpop.f32.mrb[3].mxu0  ;;  %v119_v25 = vmax.f32 %v113_v20, 0.0 }
 0x103   :  { %v120_v26 = vmax.f32 %v116_v23, 0.0 }
 0x105   :  { %v121_v27 = vpack.c.bf16 %v120_v26, %v119_v25 }
 0x107   :  { %421 = vmatmul.mubr.bf16.vlgmr.msra.gmra.mrb[0].mxu1 %v121_v27 }
 0x1da   :  { %v227_v31 = vpop.f32.mrb[0].mxu1 }
 0x1db   :  { %v228_v32 = vadd.f32 %v360_v30, %v227_v31  ;;  %v422_v33 = vpop.f32.mrb[1].mxu1 }
 0x1dc   :  { %v230_v34 = vpop.f32.mrb[2].mxu1 }
 0x1dd   :  { %v231_v35 = vadd.f32 %v360_v30, %v230_v34  ;;  %v423_v36 = vpop.f32.mrb[3].mxu1  ;;  %v234_v37 = vmax.f32 %v228_v32, 0.0 }
 0x1df   :  { %v235_v38 = vmax.f32 %v231_v35, 0.0 }
 0x1e1   :  { %v236_v39 = vpack.c.bf16 %v235_v38, %v234_v37 }
 0x1e3   :  { %441 = vmatmul.mubr.bf16.vlgmr.msra.gmra.mrb[4].mxu0 %v236_v39 }
 0x2b6   :  { %v342_v41 = vpop.f32.mrb[4].mxu0 }
 0x2b7   :  { %v343_v42 = vadd.f32 %v369_v40, %v342_v41  ;;  %v442_v43 = vpop.f32.mrb[5].mxu0 }
 0x2b8   :  { %v345_v44 = vpop.f32.mrb[6].mxu0 }
 0x2b9   :  { %349 = vst [vmem:[%s636_s7] sm:$0xff] %v343_v42  ;;  %v346_v45 = vadd.f32 %v369_v40, %v345_v44  ;;  %v443_v46 = vpop.f32.mrb[7].mxu0 }
 0x2bb   :  { %350 = vst [vmem:[%s636_s7 + $0x8] sm:$0xff] %v346_v45 }
 0x2bc   :  { %355 = vsyncpa [#allocation3], 1 }
 0x2bd   :  { %356 = vsyncpa [#allocation5], 1 }

</bundles_post_ra>
